<compile_context>
chip_gen: v7x
topology: tpu7x:2x2x1
jax: 0.10.0
libtpu: 0.0.40
codegen_flags: <defaults>
</compile_context>

<pallas_src>
import functools
import math

import jax
import jax.numpy as jnp
from jax.experimental import pallas as pl
from jax.experimental.pallas import tpu as pltpu

_LANE = 128
_MAX_WIDTH = 4096
_FALLBACK_WIDTHS = (4096, 2048, 1024, 512, 256, 128)
_TARGET_BLOCK_BYTES = 4 << 20  # ~4 MiB per block
_INV_SQRT2 = 0.7071067811865476


def _sin_quarter_poly(v):
    """sin(v + pi/4) for |v| <= pi/4, no range reduction.

    sin(v + pi/4) = (cos v + sin v) / sqrt(2); on this bounded interval short
    even/odd Taylor polynomials give < ~5e-7 absolute error.
    """
    v2 = v * v
    c = ((v2 * (1.0 / 40320.0) - (1.0 / 720.0)) * v2 + (1.0 / 24.0)) * v2 - 0.5
    cosv = c * v2 + 1.0
    s = ((v2 * (1.0 / 362880.0) - (1.0 / 5040.0)) * v2
         + (1.0 / 120.0)) * v2 - (1.0 / 6.0)
    sinv = (s * v2 + 1.0) * v
    return (cosv + sinv) * _INV_SQRT2


def _phase_kernel(x_ref, o_ref, *, mode, phase_scalar):
    x = x_ref[...]
    if x.dtype != jnp.float32:
        # HBM/VMEM stay narrow (bandwidth win); transcendentals run in f32.
        x = x.astype(jnp.float32)
    if mode == "sin":
        # sigmoid(s*x) * (pi/2) == tanh(0.5*s*x)*pi/4 + pi/4  (single EUP op),
        # then sin() via a bounded-range polynomial (halves the VALU work vs
        # jnp.sin's range reduction - matters on v7x where this mode is
        # VALU-bound).
        v = jnp.tanh(x * (0.5 * phase_scalar)) * (math.pi / 4.0)
        out = x * _sin_quarter_poly(v)
    elif mode == "translation":
        out = x + jnp.tanh(phase_scalar * x)
    elif mode == "wrap":
        # torch.fmod keeps the sign of the dividend (C-style truncated fmod).
        two_pi = 2.0 * math.pi
        inv_two_pi = 1.0 / two_pi  # compile-time constant, avoids a divide
        sx = phase_scalar * x
        wrapped = sx - jnp.trunc(sx * inv_two_pi) * two_pi
        out = jnp.sin(wrapped)
    else:
        raise ValueError(f"Unknown phase modulation mode: {mode}")
    o_ref[...] = out.astype(o_ref.dtype)


def _elementwise_jnp(x, mode, phase_scalar):
    """Plain-jnp fallback for the tiny (< w element) ragged tail."""
    xf = x.astype(jnp.float32)
    if mode == "sin":
        phase = jax.nn.sigmoid(xf * phase_scalar) * (math.pi / 2.0)
        out = xf * jnp.sin(phase)
    elif mode == "translation":
        out = xf + jnp.tanh(phase_scalar * xf)
    elif mode == "wrap":
        two_pi = 2.0 * math.pi
        sx = phase_scalar * xf
        out = jnp.sin(sx - jnp.trunc(sx / two_pi) * two_pi)
    else:
        raise ValueError(f"Unknown phase modulation mode: {mode}")
    return out.astype(x.dtype)


def _choose_width(n):
    """Pick the slab width.

    Pass 1: widest 128-multiple (<= 4096) that DIVIDES n -> zero tail, zero
            extra HBM passes (free reshape only).
    Pass 2: widest fallback that still leaves >= 8 rows of main work.
    """
    for w in range(_MAX_WIDTH, _LANE - 1, -_LANE):
        if n % w == 0:
            return w
    for w in _FALLBACK_WIDTHS:
        if n >= 8 * w:
            return w
    return _LANE


def phase_modulator(x, mode="sin", phase_scalar=1.0):
    """Pallas implementation of PhaseModulator.forward (layout agnostic)."""
    orig_shape = x.shape
    orig_dtype = x.dtype
    itemsize = jnp.dtype(orig_dtype).itemsize
    # Minimum sublane tile scales with dtype packing (f32: 8, bf16: 16, int8: 32).
    min_sublane = max(8, 32 // itemsize)

    n = 1
    for d in orig_shape:
        n *= d

    flat = x.reshape(-1)
    w = _choose_width(n)
    main_n = (n // w) * w
    tail_n = n - main_n

    if main_n == 0:
        # Degenerate tiny input (< one lane row): not worth a kernel launch.
        return _elementwise_jnp(flat, mode, phase_scalar).reshape(orig_shape)

    rows = main_n // w
    if tail_n:
        main = flat[:main_n].reshape(rows, w)
    else:
        main = flat.reshape(rows, w)  # pure bitcast reshape, no copy

    # Rows per block targeting ~4 MiB; ragged last block is handled by the
    # cdiv grid + Pallas block masking.
    rows_per_block = max(1, _TARGET_BLOCK_BYTES // (w * itemsize))
    # v7x: guarantee >= 2 grid blocks when there is enough work so that
    # dimension_semantics=("parallel",) shards across both TensorCores.
    if rows >= 2 * min_sublane:
        half_rows = -(-rows // 2)
        half_rows = -(-half_rows // min_sublane) * min_sublane
        rows_per_block = min(rows_per_block, half_rows)

    if rows_per_block >= rows:
        block_rows = rows  # full-dim block is always a legal block shape
    else:
        block_rows = max(min_sublane,
                         (rows_per_block // min_sublane) * min_sublane)
        block_rows = min(block_rows, rows)
    grid = (pl.cdiv(rows, block_rows),)

    kernel = functools.partial(_phase_kernel, mode=mode,
                               phase_scalar=float(phase_scalar))

    out_main = pl.pallas_call(
        kernel,
        out_shape=jax.ShapeDtypeStruct((rows, w), orig_dtype),
        grid_spec=pltpu.PrefetchScalarGridSpec(
            num_scalar_prefetch=0,
            grid=grid,
            in_specs=[pl.BlockSpec((block_rows, w), lambda i: (i, 0))],
            out_specs=pl.BlockSpec((block_rows, w), lambda i: (i, 0)),
        ),
        # No input_output_aliases: input is not donated at this boundary, so
        # aliasing would force a hidden defensive copy (extra HBM pass).
        compiler_params=pltpu.CompilerParams(
            dimension_semantics=("parallel",),
            vmem_limit_bytes=32 * 1024 * 1024,
        ),
    )(main)

    if tail_n:
        tail_out = _elementwise_jnp(flat[main_n:], mode, phase_scalar)
        out_flat = jnp.concatenate([out_main.reshape(-1), tail_out])
    else:
        out_flat = out_main.reshape(-1)
    return out_flat.reshape(orig_shape)


def _reference(x, mode, phase_scalar):
    """Faithful f32 translation of the PyTorch forward."""
    xf = x.astype(jnp.float32)
    if mode == "sin":
        phase = jax.nn.sigmoid(xf * phase_scalar) * (math.pi / 2.0)
        return xf * jnp.sin(phase)
    elif mode == "translation":
        return xf + jnp.tanh(phase_scalar * xf)
    elif mode == "wrap":
        return jnp.sin(jnp.fmod(phase_scalar * xf, 2.0 * math.pi))
    raise ValueError(mode)


if __name__ == "__main__":
    key = jax.random.PRNGKey(0)
    k0, k1, k2 = jax.random.split(key, 3)

    cases = []
    # NCHW feature map, element count divisible by 128 -> zero-copy fast path.
    cases.append((jax.random.normal(k0, (2, 4, 16, 16), dtype=jnp.float32) * 3.0,
                  1e-5))
    # Ragged shape -> main slab + tiny jnp tail path (no whole-array pad).
    cases.append((jax.random.normal(k1, (2, 3, 17, 19), dtype=jnp.float32) * 3.0,
                  1e-5))
    # bf16 input: narrow in HBM/VMEM, f32 compute inside the kernel.
    x_bf16 = (jax.random.normal(k2, (2, 4, 16, 16), dtype=jnp.float32) * 3.0
              ).astype(jnp.bfloat16)
    cases.append((x_bf16, 2e-2))

    ok = True
    for x, tol in cases:
        for mode in ("sin", "translation", "wrap"):
            y = phase_modulator(x, mode=mode, phase_scalar=1.0)
            y = jax.block_until_ready(y)
            y_ref = _reference(x, mode, 1.0)
            if y.shape != x.shape or y.dtype != x.dtype:
                ok = False
            if not jnp.allclose(y.astype(jnp.float32), y_ref,
                                atol=tol, rtol=tol):
                ok = False

    if ok:
        print("KERNEL_OK")
    else:
        print("KERNEL_MISMATCH")
</pallas_src>

<mosaic_0001>
module attributes {stable_mosaic.version = 11 : i64} {
  func.func @_phase_kernel(%arg0: i32, %arg1: memref<1x2048xf32, #tpu.memory_space<vmem>>, %arg2: memref<1x2048xf32, #tpu.memory_space<vmem>>) attributes {dimension_semantics = [#tpu.dimension_semantics<parallel>], iteration_bounds = array<i64: 1>, scalar_prefetch = 0 : i64, scratch_operands = 0 : i64, tpu.core_type = #tpu.core_type<tc>, window_params = [{transform_indices = @transform_0, window_bounds = array<i64: 1, 2048>}, {transform_indices = @transform_1, window_bounds = array<i64: 1, 2048>}]} {
    %c0 = arith.constant 0 : index
    %c0_0 = arith.constant 0 : index
    %0 = vector.load %arg1[%c0, %c0_0] : memref<1x2048xf32, #tpu.memory_space<vmem>>, vector<1x2048xf32>
    %cst = arith.constant 5.000000e-01 : f32
    %1 = vector.broadcast %cst : f32 to vector<1x2048xf32>
    %2 = arith.mulf %0, %1 : vector<1x2048xf32>
    %3 = math.tanh %2 : vector<1x2048xf32>
    %cst_1 = arith.constant 0.785398185 : f32
    %4 = vector.broadcast %cst_1 : f32 to vector<1x2048xf32>
    %5 = arith.mulf %3, %4 : vector<1x2048xf32>
    %6 = arith.mulf %5, %5 : vector<1x2048xf32>
    %cst_2 = arith.constant 2.48015876E-5 : f32
    %7 = vector.broadcast %cst_2 : f32 to vector<1x2048xf32>
    %8 = arith.mulf %6, %7 : vector<1x2048xf32>
    %cst_3 = arith.constant 0.00138888892 : f32
    %9 = vector.broadcast %cst_3 : f32 to vector<1x2048xf32>
    %10 = arith.subf %8, %9 : vector<1x2048xf32>
    %11 = arith.mulf %10, %6 : vector<1x2048xf32>
    %cst_4 = arith.constant 0.0416666679 : f32
    %12 = vector.broadcast %cst_4 : f32 to vector<1x2048xf32>
    %13 = arith.addf %11, %12 : vector<1x2048xf32>
    %14 = arith.mulf %13, %6 : vector<1x2048xf32>
    %cst_5 = arith.constant 5.000000e-01 : f32
    %15 = vector.broadcast %cst_5 : f32 to vector<1x2048xf32>
    %16 = arith.subf %14, %15 : vector<1x2048xf32>
    %17 = arith.mulf %16, %6 : vector<1x2048xf32>
    %cst_6 = arith.constant 1.000000e+00 : f32
    %18 = vector.broadcast %cst_6 : f32 to vector<1x2048xf32>
    %19 = arith.addf %17, %18 : vector<1x2048xf32>
    %cst_7 = arith.constant 2.75573188E-6 : f32
    %20 = vector.broadcast %cst_7 : f32 to vector<1x2048xf32>
    %21 = arith.mulf %6, %20 : vector<1x2048xf32>
    %cst_8 = arith.constant 1.98412701E-4 : f32
    %22 = vector.broadcast %cst_8 : f32 to vector<1x2048xf32>
    %23 = arith.subf %21, %22 : vector<1x2048xf32>
    %24 = arith.mulf %23, %6 : vector<1x2048xf32>
    %cst_9 = arith.constant 0.00833333377 : f32
    %25 = vector.broadcast %cst_9 : f32 to vector<1x2048xf32>
    %26 = arith.addf %24, %25 : vector<1x2048xf32>
    %27 = arith.mulf %26, %6 : vector<1x2048xf32>
    %cst_10 = arith.constant 0.166666672 : f32
    %28 = vector.broadcast %cst_10 : f32 to vector<1x2048xf32>
    %29 = arith.subf %27, %28 : vector<1x2048xf32>
    %30 = arith.mulf %29, %6 : vector<1x2048xf32>
    %cst_11 = arith.constant 1.000000e+00 : f32
    %31 = vector.broadcast %cst_11 : f32 to vector<1x2048xf32>
    %32 = arith.addf %30, %31 : vector<1x2048xf32>
    %33 = arith.mulf %32, %5 : vector<1x2048xf32>
    %34 = arith.addf %19, %33 : vector<1x2048xf32>
    %cst_12 = arith.constant 0.707106769 : f32
    %35 = vector.broadcast %cst_12 : f32 to vector<1x2048xf32>
    %36 = arith.mulf %34, %35 : vector<1x2048xf32>
    %37 = arith.mulf %0, %36 : vector<1x2048xf32>
    %c0_13 = arith.constant 0 : index
    %c0_14 = arith.constant 0 : index
    %38 = vector.load %arg2[%c0_13, %c0_14] : memref<1x2048xf32, #tpu.memory_space<vmem>>, vector<1x2048xf32>
    tpu.vector_store %arg2[%c0_13, %c0_14], %37 {strides = array<i32>} : memref<1x2048xf32, #tpu.memory_space<vmem>>, vector<1x2048xf32>,
    return
  }
  func.func @transform_0(%arg0: i32) -> (i32, i32) {
    %c0_i32 = arith.constant 0 : i32
    %c0_i32_0 = arith.constant 0 : i32
    return %arg0, %c0_i32 : i32, i32
  }
  func.func @transform_1(%arg0: i32) -> (i32, i32) {
    %c0_i32 = arith.constant 0 : i32
    %c0_i32_0 = arith.constant 0 : i32
    return %arg0, %c0_i32 : i32, i32
  }
}

</mosaic_0001>

<bundles_post_ra>
// kernel: tpu_custom_call.1
= control target key start
LH: loop header
LB: loop body
LE: loop exit
PB: predicated region body
PF: predicated region fallthrough
CT: control target
= control target key end

     0   :  { %6 = vsyncpa [#allocation3], 0  ;;  %s186_s0 = inlined_call_operand.hbm [shape: f32[1,2048], index: 0, kind: input, shape index: {}]   ;;  %s187_s1 = inlined_call_operand.hbm [shape: f32[1,2048], index: 1, kind: output, shape index: {}]  }
   0x1   :  { %7 = vsyncpa [#allocation4], 0  ;;  %s150_s6 = smov [#allocation2]   ;;  %s102_s10 = scalar_lea.hbm %s186_s0, 256 }
   0x2   :  { %s14_s7 = sshll.u32 %s150_s6, 4  ;;  %p103_p0 = scmp.ne.s32.totalorder %s186_s0, %s102_s10  ;;  %s15_s7 = int_to_ptr.vmem [resolvable:$true] %s14_s7 }
   0x3   :  { %p106_p1 = scmp.lt.u32.totalorder %s102_s10, %s186_s0 }
   0x5   :  { %p108_p2 = pnand %p106_p1, %p103_p0 }
   0x7   :  { %111 = shalt.err (!%p108_p2)
}
   0x8   :  { %s112_s15 = scalar_lea.vmem %s15_s7, 256  ;;  %p117_p4 = scmp.lt.s32.totalorder %s15_s7, %s15_s7 }
   0x9   :  { %p113_p3 = scmp.ne.s32.totalorder %s15_s7, %s112_s15  ;;  %p118_p5 = scmp.lt.s32.totalorder %s112_s15, %s112_s15 }
   0xb   :  { %p119_p6 = por %p118_p5, %p117_p4 }
   0xd   :  { %p120_p7 = pnand %p119_p6, %p113_p3 }
   0xf   :  { %123 = shalt.err (!%p120_p7)
}
  0x10   :  { %17 = dma.hbm_to_vmem [thread:$0]  %s186_s0, 256, %s15_s7, [#allocation3]  }
  0x11   :  { %146 = dma.done.wait [#allocation3], 256  }
  0x12   :  { %147 = vsyncadd [#allocation3], 4294967040  ;;  %v21_v0 = vld [vmem:[#allocation2] sm:$0xff]  ;;  %v22_v1 = vld [vmem:[#allocation2 + $0x8] sm:$0xff]  ;;  %s151_s0 = smov [#allocation5]  }
  0x13   :  { %v23_v2 = vmul.f32 0.5, %v21_v0  ;;  %v24_v3 = vmul.f32 0.5, %v22_v1  ;;  %s79_s18 = sshll.u32 %s151_s0, 4  ;;  %s80_s18 = int_to_ptr.vmem [resolvable:$true] %s79_s18 }
  0x14   :  { %s124_s19 = scalar_lea.vmem %s80_s18, 256  ;;  %p129_p9 = scmp.lt.s32.totalorder %s80_s18, %s80_s18 }
  0x15   :  { %98 = vtanh.f32 %v23_v2  ;;  %p125_p8 = scmp.ne.s32.totalorder %s80_s18, %s124_s19  ;;  %p130_p10 = scmp.lt.s32.totalorder %s124_s19, %s124_s19 }
  0x16   :  { %100 = vtanh.f32 %v24_v3 }
  0x17   :  { %p131_p11 = por %p130_p10, %p129_p9 }
  0x19   :  { %p132_p12 = pnand %p131_p11, %p125_p8 }
  0x1f   :  { %v99_v4 = vpop.eup %98 }
  0x20   :  { %v101_v5 = vpop.eup %100  ;;  %v27_v6 = vmul.f32 0.7853982, %v99_v4 }
  0x21   :  { %v28_v7 = vmul.f32 0.7853982, %v101_v5 }
  0x22   :  { %v29_v8 = vmul.f32 %v27_v6, %v27_v6 }
  0x23   :  { %v30_v9 = vmul.f32 %v28_v7, %v28_v7 }
  0x24   :  { %v31_v10 = vmul.f32 2.4801588e-05, %v29_v8  ;;  %v47_v11 = vmul.f32 2.7557319e-06, %v29_v8 }
  0x25   :  { %v32_v12 = vmul.f32 2.4801588e-05, %v30_v9  ;;  %v48_v13 = vmul.f32 2.7557319e-06, %v30_v9 }
  0x26   :  { %v88_v14 = vadd.f32 -0.0013888889, %v31_v10  ;;  %v92_v15 = vadd.f32 -0.0001984127, %v47_v11 }
  0x27   :  { %v89_v16 = vadd.f32 -0.0013888889, %v32_v12  ;;  %v93_v17 = vadd.f32 -0.0001984127, %v48_v13 }
  0x28   :  { %v35_v18 = vmul.f32 %v88_v14, %v29_v8  ;;  %v51_v19 = vmul.f32 %v92_v15, %v29_v8 }
  0x29   :  { %v36_v20 = vmul.f32 %v89_v16, %v30_v9  ;;  %v52_v21 = vmul.f32 %v93_v17, %v30_v9 }
  0x2a   :  { %v37_v22 = vadd.f32 0.041666668, %v35_v18  ;;  %v53_v23 = vadd.f32 0.008333334, %v51_v19 }
  0x2b   :  { %v38_v24 = vadd.f32 0.041666668, %v36_v20  ;;  %v54_v25 = vadd.f32 0.008333334, %v52_v21 }
  0x2c   :  { %v39_v26 = vmul.f32 %v37_v22, %v29_v8  ;;  %v55_v27 = vmul.f32 %v53_v23, %v29_v8 }
  0x2d   :  { %v40_v28 = vmul.f32 %v38_v24, %v30_v9  ;;  %v56_v29 = vmul.f32 %v54_v25, %v30_v9 }
  0x2e   :  { %v90_v30 = vadd.f32 -0.5, %v39_v26  ;;  %v94_v31 = vadd.f32 -0.16666667, %v55_v27 }
  0x2f   :  { %v91_v32 = vadd.f32 -0.5, %v40_v28  ;;  %v95_v33 = vadd.f32 -0.16666667, %v56_v29 }
  0x30   :  { %v43_v34 = vmul.f32 %v90_v30, %v29_v8  ;;  %v59_v35 = vmul.f32 %v94_v31, %v29_v8 }
  0x31   :  { %v44_v36 = vmul.f32 %v91_v32, %v30_v9  ;;  %v60_v37 = vmul.f32 %v95_v33, %v30_v9 }
  0x32   :  { %v45_v38 = vadd.f32 1.0, %v43_v34  ;;  %v61_v39 = vadd.f32 1.0, %v59_v35 }
  0x33   :  { %v46_v40 = vadd.f32 1.0, %v44_v36  ;;  %v62_v41 = vadd.f32 1.0, %v60_v37 }
  0x34   :  { %v63_v42 = vmul.f32 %v61_v39, %v27_v6 }
  0x35   :  { %v64_v43 = vmul.f32 %v62_v41, %v28_v7 }
  0x36   :  { %v65_v44 = vadd.f32 %v63_v42, %v45_v38 }
  0x37   :  { %v66_v45 = vadd.f32 %v64_v43, %v46_v40 }
  0x38   :  { %v67_v46 = vmul.f32 0.70710677, %v65_v44 }
  0x39   :  { %v68_v47 = vmul.f32 0.70710677, %v66_v45 }
  0x3a   :  { %v69_v48 = vmul.f32 %v67_v46, %v21_v0 }
  0x3b   :  { %v70_v49 = vmul.f32 %v68_v47, %v22_v1 }
  0x3c   :  { %71 = vst [vmem:[#allocation5] sm:$0xff] %v69_v48 }
  0x3d   :  { %72 = vst [vmem:[#allocation5 + $0x8] sm:$0xff] %v70_v49 }
  0x3e   :  { %135 = shalt.err (!%p132_p12)
}
  0x3f   :  { %s136_s22 = scalar_lea.hbm %s187_s1, 256 }
  0x40   :  { %p137_p13 = scmp.ne.s32.totalorder %s187_s1, %s136_s22  ;;  %p140_p0 = scmp.lt.u32.totalorder %s136_s22, %s187_s1 }
  0x42   :  { %p142_p1 = pnand %p140_p0, %p137_p13 }
  0x44   :  { %145 = shalt.err (!%p142_p1)
}
  0x45   :  { %82 = dma.vmem_to_hbm [thread:$0]  %s80_s18, 256, %s187_s1, [#allocation4]  }
  0x46   :  { %148 = dma.done.wait [#allocation4], 256  }
  0x47   :  { %149 = vsyncadd [#allocation4], 4294967040 }
  0x48   :  { %86 = vsyncpa [#allocation3], 1 }
  0x49   :  { %87 = vsyncpa [#allocation4], 1 }

</bundles_post_ra>
